<compile_context>
chip_gen: v7x
topology: tpu7x:2x2x1
jax: 0.10.0
libtpu: 0.0.40
codegen_flags: <defaults>
</compile_context>

<pallas_src>
import functools

import jax
import jax.numpy as jnp
from jax.experimental import pallas as pl
from jax.experimental.pallas import tpu as pltpu

LN_EPS = 1e-5  # PyTorch nn.LayerNorm default


def _round_up(x, m):
    return ((x + m - 1) // m) * m


def _make_ffn_kernel(l_true, lp):
    """Build the kernel with static true-L (for masked LayerNorm stats)."""
    need_mask = l_true != lp
    inv_l = 1.0 / float(l_true)

    def ffn_kernel(x_ref, gamma_ref, beta_ref, w1_ref, b1_ref, w2_ref, b2_ref, o_ref):
        # x_ref: (TM, Lp) tile of flattened input rows (f32)
        x = x_ref[...].astype(jnp.float32)

        if need_mask:
            lane = jax.lax.broadcasted_iota(jnp.int32, x.shape, 1)
            mask = lane < l_true
            x = jnp.where(mask, x, 0.0)

        # LayerNorm over the true last dim (biased variance, matching PyTorch), f32 math.
        mean = jnp.sum(x, axis=-1, keepdims=True) * inv_l
        centered = x - mean
        if need_mask:
            centered = jnp.where(mask, centered, 0.0)
        var = jnp.sum(centered * centered, axis=-1, keepdims=True) * inv_l
        y = centered * jax.lax.rsqrt(var + LN_EPS)
        # gamma/beta are zero-padded past l_true, so padded lanes of y become exactly 0.
        y = y * gamma_ref[...] + beta_ref[...]                     # (TM, Lp) f32

        # dense1: Linear(L -> 2L) + ReLU (dropout p=0.0 -> identity). bf16 operands, f32 acc.
        h = jnp.dot(y.astype(jnp.bfloat16), w1_ref[...],
                    preferred_element_type=jnp.float32) + b1_ref[...]
        h = jnp.maximum(h, 0.0)                                    # (TM, Hp) f32

        # dense2: Linear(2L -> L), no activation. bf16 operands, f32 acc.
        out = jnp.dot(h.astype(jnp.bfloat16), w2_ref[...],
                      preferred_element_type=jnp.float32) + b2_ref[...]
        o_ref[...] = out.astype(o_ref.dtype)                       # (TM, Lp)

    return ffn_kernel


def feed_forward_block(x, gamma, beta, w1, b1, w2, b2, *, tm=256):
    """x: (N, C, L) float32. Returns (N, C, L). Weights given as (L,2L)/(2L,L) transposed."""
    N, C, L = x.shape
    H = w1.shape[1]  # 2L
    M = N * C

    # Lane-dense feature dims (multiples of 128); MXU-friendly row tile; padded row count.
    Lp = _round_up(L, 128)
    Hp = _round_up(H, 128)
    tm_eff = min(tm, _round_up(M, 8))
    Mp = _round_up(M, tm_eff)
    grid = (Mp // tm_eff,)

    # Zero-pad everything so padded lanes/rows are inert (see kernel comments).
    x2 = jnp.pad(x.reshape(M, L).astype(jnp.float32), ((0, Mp - M), (0, Lp - L)))
    gamma_p = jnp.pad(gamma.reshape(1, L).astype(jnp.float32), ((0, 0), (0, Lp - L)))
    beta_p = jnp.pad(beta.reshape(1, L).astype(jnp.float32), ((0, 0), (0, Lp - L)))
    w1_p = jnp.pad(w1, ((0, Lp - L), (0, Hp - H))).astype(jnp.bfloat16)
    b1_p = jnp.pad(b1.reshape(1, H).astype(jnp.float32), ((0, 0), (0, Hp - H)))
    w2_p = jnp.pad(w2, ((0, Hp - H), (0, Lp - L))).astype(jnp.bfloat16)
    b2_p = jnp.pad(b2.reshape(1, L).astype(jnp.float32), ((0, 0), (0, Lp - L)))

    # Advisory cost estimate for XLA's scheduler.
    flops = 4 * Mp * Lp * Hp  # two GEMMs: 2*M*L*H + 2*M*H*L
    bytes_accessed = (x2.size * 4 + Mp * Lp * 4
                      + w1_p.size * 2 + w2_p.size * 2
                      + (gamma_p.size + beta_p.size + b1_p.size + b2_p.size) * 4)
    cost = pl.CostEstimate(flops=flops, transcendentals=Mp, bytes_accessed=bytes_accessed)

    # Explicit VMEM budget (double-buffered x/out tiles, bf16 weights, f32 intermediates),
    # capped at 64 MiB so the same kernel is portable to v7x.
    vmem_est = (2 * tm_eff * Lp * 4            # x tiles (double-buffered)
                + 2 * tm_eff * Lp * 4          # out tiles
                + 2 * (Lp * Hp + Hp * Lp) * 2  # bf16 weights (double-buffered)
                + 2 * (Hp + 3 * Lp) * 4        # biases + gamma/beta
                + 2 * tm_eff * Hp * 4)         # in-kernel intermediates headroom
    vmem_limit = min(max(int(vmem_est * 1.5), 32 * 1024 * 1024), 64 * 1024 * 1024)

    kernel = _make_ffn_kernel(L, Lp)

    out = pl.pallas_call(
        kernel,
        out_shape=jax.ShapeDtypeStruct((Mp, Lp), x.dtype),
        grid_spec=pltpu.PrefetchScalarGridSpec(
            num_scalar_prefetch=0,
            grid=grid,
            in_specs=[
                pl.BlockSpec((tm_eff, Lp), lambda i: (i, 0)),  # x rows
                pl.BlockSpec((1, Lp), lambda i: (0, 0)),       # gamma
                pl.BlockSpec((1, Lp), lambda i: (0, 0)),       # beta
                pl.BlockSpec((Lp, Hp), lambda i: (0, 0)),      # W1^T (bf16)
                pl.BlockSpec((1, Hp), lambda i: (0, 0)),       # b1
                pl.BlockSpec((Hp, Lp), lambda i: (0, 0)),      # W2^T (bf16)
                pl.BlockSpec((1, Lp), lambda i: (0, 0)),       # b2
            ],
            out_specs=pl.BlockSpec((tm_eff, Lp), lambda i: (i, 0)),
        ),
        compiler_params=pltpu.CompilerParams(
            dimension_semantics=("parallel",),
            vmem_limit_bytes=vmem_limit,
        ),
        cost_estimate=cost,
    )(x2, gamma_p, beta_p, w1_p, b1_p, w2_p, b2_p)

    return out[:M, :L].reshape(N, C, L)


def init_params(key, in_len):
    """Deterministic parameter init (same shapes as the PyTorch module), f32 master copies."""
    L, H = in_len, in_len * 2
    k1, k2, k3, k4 = jax.random.split(key, 4)
    # LayerNorm(in_len): gamma=1, beta=0 (PyTorch default init)
    gamma = jnp.ones((1, L), jnp.float32)
    beta = jnp.zeros((1, L), jnp.float32)
    # Linear(L, 2L): store transposed weight (L, 2L)
    lim1 = 1.0 / jnp.sqrt(L)
    w1 = jax.random.uniform(k1, (L, H), jnp.float32, -lim1, lim1)
    b1 = jax.random.uniform(k2, (1, H), jnp.float32, -lim1, lim1)
    # Linear(2L, L): store transposed weight (2L, L)
    lim2 = 1.0 / jnp.sqrt(H)
    w2 = jax.random.uniform(k3, (H, L), jnp.float32, -lim2, lim2)
    b2 = jax.random.uniform(k4, (1, L), jnp.float32, -lim2, lim2)
    return gamma, beta, w1, b1, w2, b2


def reference(x, gamma, beta, w1, b1, w2, b2):
    """Pure f32 JAX reference matching the PyTorch FeedForwardBlock forward."""
    mean = jnp.mean(x, axis=-1, keepdims=True)
    var = jnp.mean((x - mean) ** 2, axis=-1, keepdims=True)
    y = (x - mean) / jnp.sqrt(var + LN_EPS) * gamma[0] + beta[0]
    h = jnp.maximum(y @ w1 + b1[0], 0.0)
    return h @ w2 + b2[0]


if __name__ == "__main__":
    N, C, in_len = 2, 8, 32  # input (N, C, L); hidden = 64
    key = jax.random.PRNGKey(0)
    kx, kp = jax.random.split(key)
    x = jax.random.normal(kx, (N, C, in_len), jnp.float32)
    params = init_params(kp, in_len)

    out = feed_forward_block(x, *params)
    out = jax.block_until_ready(out)

    ref = reference(x, *params)
    assert out.shape == (N, C, in_len)
    # bf16 matmul operands (f32 accumulation) vs pure-f32 reference -> loosened tolerance.
    assert jnp.allclose(out, ref, atol=5e-2, rtol=5e-2), "mismatch vs reference"
    print("KERNEL_OK")
</pallas_src>

<mosaic_0001>
module attributes {stable_mosaic.version = 11 : i64} {
  func.func @ffn_kernel(%arg0: i32, %arg1: memref<16x128xf32, #tpu.memory_space<vmem>>, %arg2: memref<1x128xf32, #tpu.memory_space<vmem>>, %arg3: memref<1x128xf32, #tpu.memory_space<vmem>>, %arg4: memref<128x128xbf16, #tpu.memory_space<vmem>>, %arg5: memref<1x128xf32, #tpu.memory_space<vmem>>, %arg6: memref<128x128xbf16, #tpu.memory_space<vmem>>, %arg7: memref<1x128xf32, #tpu.memory_space<vmem>>, %arg8: memref<16x128xf32, #tpu.memory_space<vmem>>) attributes {dimension_semantics = [#tpu.dimension_semantics<parallel>], iteration_bounds = array<i64: 1>, scalar_prefetch = 0 : i64, scratch_operands = 0 : i64, tpu.core_type = #tpu.core_type<tc>, window_params = [{transform_indices = @transform_0, window_bounds = array<i64: 16, 128>}, {pipeline_mode = #tpu.pipeline_mode<synchronous>, transform_indices = @transform_1, window_bounds = array<i64: 1, 128>}, {pipeline_mode = #tpu.pipeline_mode<synchronous>, transform_indices = @transform_2, window_bounds = array<i64: 1, 128>}, {pipeline_mode = #tpu.pipeline_mode<synchronous>, transform_indices = @transform_3, window_bounds = array<i64: 128, 128>}, {pipeline_mode = #tpu.pipeline_mode<synchronous>, transform_indices = @transform_4, window_bounds = array<i64: 1, 128>}, {pipeline_mode = #tpu.pipeline_mode<synchronous>, transform_indices = @transform_5, window_bounds = array<i64: 128, 128>}, {pipeline_mode = #tpu.pipeline_mode<synchronous>, transform_indices = @transform_6, window_bounds = array<i64: 1, 128>}, {transform_indices = @transform_7, window_bounds = array<i64: 16, 128>}]} {
    %c0 = arith.constant 0 : index
    %c0_0 = arith.constant 0 : index
    %0 = vector.load %arg1[%c0, %c0_0] : memref<16x128xf32, #tpu.memory_space<vmem>>, vector<16x128xf32>
    %1 = tpu.iota {dimensions = array<i32: 1>} : vector<16x128xi32>
    %c32_i32 = arith.constant 32 : i32
    %2 = vector.broadcast %c32_i32 : i32 to vector<16x128xi32>
    %3 = arith.cmpi slt, %1, %2 : vector<16x128xi32>
    %cst = arith.constant 0.000000e+00 : f32
    %4 = vector.broadcast %cst : f32 to vector<16x128xf32>
    %5 = arith.select %3, %0, %4 : vector<16x128xi1>, vector<16x128xf32>
    %cst_1 = arith.constant dense<0.000000e+00> : vector<16xf32>
    %6 = vector.multi_reduction <add>, %5, %cst_1 [1] : vector<16x128xf32> to vector<16xf32>
    %7 = vector.shape_cast %6 : vector<16xf32> to vector<16x1xf32>
    %cst_2 = arith.constant 3.125000e-02 : f32
    %8 = vector.broadcast %cst_2 : f32 to vector<16x1xf32>
    %9 = arith.mulf %7, %8 : vector<16x1xf32>
    %10 = vector.broadcast %9 : vector<16x1xf32> to vector<16x128xf32>
    %11 = arith.subf %5, %10 : vector<16x128xf32>
    %cst_3 = arith.constant 0.000000e+00 : f32
    %12 = vector.broadcast %cst_3 : f32 to vector<16x128xf32>
    %13 = arith.select %3, %11, %12 : vector<16x128xi1>, vector<16x128xf32>
    %14 = arith.mulf %13, %13 : vector<16x128xf32>
    %cst_4 = arith.constant dense<0.000000e+00> : vector<16xf32>
    %15 = vector.multi_reduction <add>, %14, %cst_4 [1] : vector<16x128xf32> to vector<16xf32>
    %16 = vector.shape_cast %15 : vector<16xf32> to vector<16x1xf32>
    %cst_5 = arith.constant 3.125000e-02 : f32
    %17 = vector.broadcast %cst_5 : f32 to vector<16x1xf32>
    %18 = arith.mulf %16, %17 : vector<16x1xf32>
    %cst_6 = arith.constant 9.99999974E-6 : f32
    %19 = vector.broadcast %cst_6 : f32 to vector<16x1xf32>
    %20 = arith.addf %18, %19 : vector<16x1xf32>
    %21 = math.rsqrt %20 : vector<16x1xf32>
    %22 = vector.broadcast %21 : vector<16x1xf32> to vector<16x128xf32>
    %23 = arith.mulf %13, %22 : vector<16x128xf32>
    %c0_7 = arith.constant 0 : index
    %c0_8 = arith.constant 0 : index
    %24 = vector.load %arg2[%c0_7, %c0_8] : memref<1x128xf32, #tpu.memory_space<vmem>>, vector<1x128xf32>
    %25 = vector.broadcast %24 : vector<1x128xf32> to vector<16x128xf32>
    %26 = arith.mulf %23, %25 : vector<16x128xf32>
    %c0_9 = arith.constant 0 : index
    %c0_10 = arith.constant 0 : index
    %27 = vector.load %arg3[%c0_9, %c0_10] : memref<1x128xf32, #tpu.memory_space<vmem>>, vector<1x128xf32>
    %28 = vector.broadcast %27 : vector<1x128xf32> to vector<16x128xf32>
    %29 = arith.addf %26, %28 : vector<16x128xf32>
    %30 = arith.truncf %29 : vector<16x128xf32> to vector<16x128xbf16>
    %c0_11 = arith.constant 0 : index
    %c0_12 = arith.constant 0 : index
    %31 = vector.load %arg4[%c0_11, %c0_12] : memref<128x128xbf16, #tpu.memory_space<vmem>>, vector<128x128xbf16>
    %cst_13 = arith.constant dense<0.000000e+00> : vector<16x128xf32>
    %32 = tpu.matmul %30, %31, %cst_13 {dimension_numbers = #tpu.dot_dimension_numbers<[1], [0], [0], [1], [0, 0, 1, 1], [], []>} : vector<16x128xbf16>, vector<128x128xbf16>, vector<16x128xf32> -> vector<16x128xf32>
    %c0_14 = arith.constant 0 : index
    %c0_15 = arith.constant 0 : index
    %33 = vector.load %arg5[%c0_14, %c0_15] : memref<1x128xf32, #tpu.memory_space<vmem>>, vector<1x128xf32>
    %34 = vector.broadcast %33 : vector<1x128xf32> to vector<16x128xf32>
    %35 = arith.addf %32, %34 : vector<16x128xf32>
    %cst_16 = arith.constant 0.000000e+00 : f32
    %36 = vector.broadcast %cst_16 : f32 to vector<16x128xf32>
    %37 = arith.maximumf %35, %36 : vector<16x128xf32>
    %38 = arith.truncf %37 : vector<16x128xf32> to vector<16x128xbf16>
    %c0_17 = arith.constant 0 : index
    %c0_18 = arith.constant 0 : index
    %39 = vector.load %arg6[%c0_17, %c0_18] : memref<128x128xbf16, #tpu.memory_space<vmem>>, vector<128x128xbf16>
    %cst_19 = arith.constant dense<0.000000e+00> : vector<16x128xf32>
    %40 = tpu.matmul %38, %39, %cst_19 {dimension_numbers = #tpu.dot_dimension_numbers<[1], [0], [0], [1], [0, 0, 1, 1], [], []>} : vector<16x128xbf16>, vector<128x128xbf16>, vector<16x128xf32> -> vector<16x128xf32>
    %c0_20 = arith.constant 0 : index
    %c0_21 = arith.constant 0 : index
    %41 = vector.load %arg7[%c0_20, %c0_21] : memref<1x128xf32, #tpu.memory_space<vmem>>, vector<1x128xf32>
    %42 = vector.broadcast %41 : vector<1x128xf32> to vector<16x128xf32>
    %43 = arith.addf %40, %42 : vector<16x128xf32>
    %c0_22 = arith.constant 0 : index
    %c0_23 = arith.constant 0 : index
    %44 = vector.load %arg8[%c0_22, %c0_23] : memref<16x128xf32, #tpu.memory_space<vmem>>, vector<16x128xf32>
    tpu.vector_store %arg8[%c0_22, %c0_23], %43 {strides = array<i32>} : memref<16x128xf32, #tpu.memory_space<vmem>>, vector<16x128xf32>,
    return
  }
  func.func @transform_0(%arg0: i32) -> (i32, i32) {
    %c0_i32 = arith.constant 0 : i32
    %c0_i32_0 = arith.constant 0 : i32
    return %arg0, %c0_i32 : i32, i32
  }
  func.func @transform_1(%arg0: i32) -> (i32, i32) {
    %c0_i32 = arith.constant 0 : i32
    %c0_i32_0 = arith.constant 0 : i32
    %c0_i32_1 = arith.constant 0 : i32
    return %c0_i32, %c0_i32_0 : i32, i32
  }
  func.func @transform_2(%arg0: i32) -> (i32, i32) {
    %c0_i32 = arith.constant 0 : i32
    %c0_i32_0 = arith.constant 0 : i32
    %c0_i32_1 = arith.constant 0 : i32
    return %c0_i32, %c0_i32_0 : i32, i32
  }
  func.func @transform_3(%arg0: i32) -> (i32, i32) {
    %c0_i32 = arith.constant 0 : i32
    %c0_i32_0 = arith.constant 0 : i32
    %c0_i32_1 = arith.constant 0 : i32
    return %c0_i32, %c0_i32_0 : i32, i32
  }
  func.func @transform_4(%arg0: i32) -> (i32, i32) {
    %c0_i32 = arith.constant 0 : i32
    %c0_i32_0 = arith.constant 0 : i32
    %c0_i32_1 = arith.constant 0 : i32
    return %c0_i32, %c0_i32_0 : i32, i32
  }
  func.func @transform_5(%arg0: i32) -> (i32, i32) {
    %c0_i32 = arith.constant 0 : i32
    %c0_i32_0 = arith.constant 0 : i32
    %c0_i32_1 = arith.constant 0 : i32
    return %c0_i32, %c0_i32_0 : i32, i32
  }
  func.func @transform_6(%arg0: i32) -> (i32, i32) {
    %c0_i32 = arith.constant 0 : i32
    %c0_i32_0 = arith.constant 0 : i32
    %c0_i32_1 = arith.constant 0 : i32
    return %c0_i32, %c0_i32_0 : i32, i32
  }
  func.func @transform_7(%arg0: i32) -> (i32, i32) {
    %c0_i32 = arith.constant 0 : i32
    %c0_i32_0 = arith.constant 0 : i32
    return %arg0, %c0_i32 : i32, i32
  }
}

</mosaic_0001>

<bundles_post_ra>
// kernel: tpu_custom_call.1
= control target key start
LH: loop header
LB: loop body
LE: loop exit
PB: predicated region body
PF: predicated region fallthrough
CT: control target
= control target key end

     0   :  { %12 = vsyncpa [#allocation3], 0  ;;  %s712_s0 = inlined_call_operand.hbm [shape: f32[16,128], index: 0, kind: input, shape index: {}]   ;;  %s713_s1 = inlined_call_operand.vmem [shape: f32[1,128], index: 1, kind: input, shape index: {}]   ;;  %s714_s2 = inlined_call_operand.vmem [shape: f32[1,128], index: 2, kind: input, shape index: {}]   ;;  %s715_s3 = inlined_call_operand.hbm [shape: bf16[128,128], index: 3, kind: input, shape index: {}]   ;;  %s716_s4 = inlined_call_operand.vmem [shape: f32[1,128], index: 4, kind: input, shape index: {}]   ;;  %s717_s5 = inlined_call_operand.hbm [shape: bf16[128,128], index: 5, kind: input, shape index: {}]   ;;  %s718_s6 = inlined_call_operand.vmem [shape: f32[1,128], index: 6, kind: input, shape index: {}]   ;;  %s719_s7 = inlined_call_operand.hbm [shape: f32[16,128], index: 7, kind: output, shape index: {}]  }
   0x1   :  { %13 = vsyncpa [#allocation6], 0 }
   0x2   :  { %14 = vsyncpa [#allocation4], 0  ;;  %s568_s24 = smov [#allocation5]   ;;  %s474_s28 = scalar_lea.hbm %s715_s3, 1024 }
   0x3   :  { %s36_s25 = sshll.u32 %s568_s24, 4  ;;  %p475_p0 = scmp.ne.s32.totalorder %s715_s3, %s474_s28  ;;  %s37_s25 = int_to_ptr.vmem [resolvable:$true] %s36_s25 }
   0x4   :  { %p478_p1 = scmp.lt.u32.totalorder %s474_s28, %s715_s3 }
   0x6   :  { %p480_p2 = pnand %p478_p1, %p475_p0 }
   0x8   :  { %483 = shalt.err (!%p480_p2)
}
   0x9   :  { %s484_s10 = scalar_lea.vmem %s37_s25, 1024  ;;  %p489_p4 = scmp.lt.s32.totalorder %s37_s25, %s37_s25 }
   0xa   :  { %p485_p3 = scmp.ne.s32.totalorder %s37_s25, %s484_s10  ;;  %p490_p5 = scmp.lt.s32.totalorder %s484_s10, %s484_s10 }
   0xc   :  { %p491_p6 = por %p490_p5, %p489_p4 }
   0xe   :  { %p492_p7 = pnand %p491_p6, %p485_p3 }
  0x10   :  { %495 = shalt.err (!%p492_p7)
}
  0x11   :  { %s569_s11 = smov 64   ;;  %s570_s12 = smov 4  }
  0x12   :  { %42 = dma.hbm_to_vmem [thread:$0]  %s715_s3, 1024, %s37_s25, [#allocation6], %s569_s11, %s569_s11, %s570_s12  }
  0x13   :  { %s571_s15 = smov [#allocation2]   ;;  %s496_s19 = scalar_lea.hbm %s712_s0, 256 }
  0x14   :  { %s20_s16 = sshll.u32 %s571_s15, 4  ;;  %p497_p8 = scmp.ne.s32.totalorder %s712_s0, %s496_s19  ;;  %s21_s16 = int_to_ptr.vmem [resolvable:$true] %s20_s16 }
  0x15   :  { %p500_p9 = scmp.lt.u32.totalorder %s496_s19, %s712_s0 }
  0x17   :  { %p502_p10 = pnand %p500_p9, %p497_p8 }
  0x19   :  { %505 = shalt.err (!%p502_p10)
}
  0x1a   :  { %s506_s24 = scalar_lea.vmem %s21_s16, 256  ;;  %p511_p12 = scmp.lt.s32.totalorder %s21_s16, %s21_s16 }
  0x1b   :  { %p507_p11 = scmp.ne.s32.totalorder %s21_s16, %s506_s24  ;;  %p512_p13 = scmp.lt.s32.totalorder %s506_s24, %s506_s24 }
  0x1d   :  { %p513_p0 = por %p512_p13, %p511_p12 }
  0x1f   :  { %p514_p1 = pnand %p513_p0, %p507_p11 }
  0x21   :  { %517 = shalt.err (!%p514_p1)
}
  0x22   :  { %s572_s3 = smov 128   ;;  %s573_s25 = smov 8  }
  0x23   :  { %26 = dma.hbm_to_vmem [thread:$0]  %s712_s0, 256, %s21_s16, [#allocation3], %s572_s3, %s572_s3, %s573_s25  }
  0x24   :  { %s574_s28 = smov [#allocation7]   ;;  %s518_s9 = scalar_lea.hbm %s717_s5, 1024 }
  0x25   :  { %s50_s29 = sshll.u32 %s574_s28, 4  ;;  %p519_p2 = scmp.ne.s32.totalorder %s717_s5, %s518_s9  ;;  %s51_s29 = int_to_ptr.vmem [resolvable:$true] %s50_s29 }
  0x26   :  { %p522_p3 = scmp.lt.u32.totalorder %s518_s9, %s717_s5 }
  0x28   :  { %p524_p4 = pnand %p522_p3, %p519_p2 }
  0x2a   :  { %527 = shalt.err (!%p524_p4)
}
  0x2b   :  { %s528_s17 = scalar_lea.vmem %s51_s29, 1024  ;;  %p533_p6 = scmp.lt.s32.totalorder %s51_s29, %s51_s29 }
  0x2c   :  { %p529_p5 = scmp.ne.s32.totalorder %s51_s29, %s528_s17  ;;  %p534_p7 = scmp.lt.s32.totalorder %s528_s17, %s528_s17 }
  0x2e   :  { %p535_p8 = por %p534_p7, %p533_p6 }
  0x30   :  { %p536_p9 = pnand %p535_p8, %p529_p5 }
  0x32   :  { %539 = shalt.err (!%p536_p9)
}
  0x33   :  { %56 = dma.hbm_to_vmem [thread:$0]  %s717_s5, 1024, %s51_s29, [#allocation6], %s569_s11, %s569_s11, %s570_s12  }
  0x34   :  { %562 = dma.done.wait [#allocation3], 256  }
  0x35   :  { %563 = vsyncadd [#allocation3], 4294967040 }
  0x36   :  { %564 = dma.done.wait [#allocation6], 2048  }
  0x37   :  { %565 = vsyncadd [#allocation6], 4294965248  ;;  %v71_v0 = vlaneseq  ;;  %v69_v2 = vld [vmem:[#allocation2] sm:$0xff]  ;;  %v70_v3 = vld [vmem:[#allocation2 + $0x8] sm:$0xff]  ;;  %v575_v7 = vmov 0.0   ;;  %vm576_vm1 = vmmov 0  }
  0x38   :  { %v454_v6 = vld [vmem:[#allocation5] sm:$0xff]   ;;  %404 = vmatprep.subr.bf16.mxu0 %v575_v7  ;;  %424 = vmatprep.subr.bf16.mxu1 %v575_v7  ;;  %v455_v18 = vld [vmem:[#allocation5 + $0x8] sm:$0xff]   ;;  %v456_v19 = vld [vmem:[#allocation5 + $0x10] sm:$0xff]   ;;  %s577_s21 = smov [#allocation8]  }
  0x39   :  { %v72_v1 = vand.u32 127, %v71_v0  ;;  %405 = vmatpush3.bf16.msra.mxu0 %v454_v6  ;;  %v457_v20 = vld [vmem:[#allocation5 + $0x18] sm:$0xff]   ;;  %v458_v21 = vld [vmem:[#allocation5 + $0x20] sm:$0xff]   ;;  %420 = vmatprep.mubr.msk.bf16.mxu0 %vm576_vm1, %v575_v7  ;;  %v459_v22 = vld [vmem:[#allocation5 + $0x28] sm:$0xff]   ;;  %s353_s22 = sshll.u32 %s577_s21, 4  ;;  %s354_s22 = int_to_ptr.vmem [resolvable:$true] %s353_s22 }
  0x3a   :  { %406 = vmatprep.subr.bf16.mxu0 %v575_v7  ;;  %440 = vmatprep.mubr.msk.bf16.mxu1 %vm576_vm1, %v575_v7  ;;  %v460_v23 = vld [vmem:[#allocation5 + $0x30] sm:$0xff]   ;;  %v461_v24 = vld [vmem:[#allocation5 + $0x38] sm:$0xff]   ;;  %v462_v25 = vld [vmem:[#allocation7] sm:$0xff]   ;;  %p545_p11 = scmp.lt.s32.totalorder %s354_s22, %s354_s22 }
  0x3b   :  { %vm73_vm0 = vcmp.lt.s32.totalorder %v72_v1, 32  ;;  %425 = vmatpush3.bf16.msra.mxu1 %v462_v25  ;;  %v463_v26 = vld [vmem:[#allocation7 + $0x8] sm:$0xff]   ;;  %v464_v27 = vld [vmem:[#allocation7 + $0x10] sm:$0xff]   ;;  %v465_v28 = vld [vmem:[#allocation7 + $0x18] sm:$0xff]  }
  0x3c   :  { %v74_v4 = vsel %vm73_vm0, %v69_v2, 0.0  ;;  %v75_v5 = vsel %vm73_vm0, %v70_v3, 0.0  ;;  %426 = vmatprep.subr.bf16.mxu1 %v575_v7  ;;  %v466_v29 = vld [vmem:[#allocation7 + $0x20] sm:$0xff]   ;;  %v467_v30 = vld [vmem:[#allocation7 + $0x28] sm:$0xff]   ;;  %v366_v39 = vld [vmem:[%s713_s1] ss:$0 sm:$0xff] }
  0x3d   :  { %76 = vadd.xlane.f32.xlu0 %v74_v4  ;;  %407 = vmatpush3.bf16.msra.mxu0 %v455_v18  ;;  %v367_v43 = vld [vmem:[%s714_s2] ss:$0 sm:$0xff]  ;;  %v469_v49 = vld [vmem:[#allocation7 + $0x38] sm:$0xff]  }
  0x3e   :  { %408 = vmatprep.subr.bf16.mxu0 %v575_v7  ;;  %v468_v48 = vld [vmem:[#allocation7 + $0x30] sm:$0xff]  }
  0x3f   :  { %427 = vmatpush3.bf16.msra.mxu1 %v463_v26  ;;  %v368_v50 = vld [vmem:[%s716_s4] ss:$0 sm:$0xff]  ;;  %s540_s4 = scalar_lea.vmem %s354_s22, 256 }
  0x40   :  { %428 = vmatprep.subr.bf16.mxu1 %v575_v7  ;;  %v377_v60 = vld [vmem:[%s718_s6] ss:$0 sm:$0xff]  ;;  %p541_p10 = scmp.ne.s32.totalorder %s354_s22, %s540_s4  ;;  %p546_p12 = scmp.lt.s32.totalorder %s540_s4, %s540_s4 }
  0x41   :  { %78 = vadd.xlane.f32.xlu0 %v75_v5  ;;  %409 = vmatpush3.bf16.msra.mxu0 %v456_v19 }
  0x42   :  { %410 = vmatprep.subr.bf16.mxu0 %v575_v7  ;;  %p547_p13 = por %p546_p12, %p545_p11 }
  0x43   :  { %429 = vmatpush3.bf16.msra.mxu1 %v464_v27 }
  0x44   :  { %430 = vmatprep.subr.bf16.mxu1 %v575_v7  ;;  %p548_p0 = pnand %p547_p13, %p541_p10 }
  0x45   :  { %411 = vmatpush3.bf16.msra.mxu0 %v457_v20 }
  0x46   :  { %412 = vmatprep.subr.bf16.mxu0 %v575_v7 }
  0x47   :  { %431 = vmatpush3.bf16.msra.mxu1 %v465_v28 }
  0x48   :  { %432 = vmatprep.subr.bf16.mxu1 %v575_v7 }
  0x49   :  { %413 = vmatpush3.bf16.msra.mxu0 %v458_v21 }
  0x4a   :  { %414 = vmatprep.subr.bf16.mxu0 %v575_v7 }
  0x4b   :  { %433 = vmatpush3.bf16.msra.mxu1 %v466_v29 }
  0x4c   :  { %434 = vmatprep.subr.bf16.mxu1 %v575_v7 }
  0x4d   :  { %415 = vmatpush3.bf16.msra.mxu0 %v459_v22 }
  0x4e   :  { %416 = vmatprep.subr.bf16.mxu0 %v575_v7 }
  0x4f   :  { %435 = vmatpush3.bf16.msra.mxu1 %v467_v30 }
  0x50   :  { %436 = vmatprep.subr.bf16.mxu1 %v575_v7 }
  0x51   :  { %417 = vmatpush3.bf16.msra.mxu0 %v460_v23 }
  0x52   :  { %418 = vmatprep.subr.bf16.mxu0 %v575_v7 }
  0x53   :  { %437 = vmatpush3.bf16.msra.mxu1 %v468_v48 }
  0x54   :  { %438 = vmatprep.subr.bf16.mxu1 %v575_v7 }
  0x55   :  { %419 = vmatpush3.bf16.msra.mxu0 %v461_v24 }
  0x57   :  { %439 = vmatpush3.bf16.msra.mxu1 %v469_v49 }
  0xca   :  { %v77_v8 = vpop.xlane.xlu0 %76 }
  0xcb   :  { %v80_v9 = vmul.f32 0.03125, %v77_v8 }
  0xcd   :  { %v82_v10 = vsub.f32 %v74_v4, %v80_v9 }
  0xce   :  { %v79_v11 = vpop.xlane.xlu0 %78 }
  0xcf   :  { %v81_v12 = vmul.f32 0.03125, %v79_v11  ;;  %v84_v13 = vsel %vm73_vm0, %v82_v10, 0.0 }
  0xd0   :  { %v86_v14 = vmul.f32 %v84_v13, %v84_v13 }
  0xd1   :  { %v83_v15 = vsub.f32 %v75_v5, %v81_v12 }
  0xd2   :  { %88 = vadd.xlane.f32.xlu1 %v86_v14 }
  0xd3   :  { %v85_v16 = vsel %vm73_vm0, %v83_v15, 0.0 }
  0xd4   :  { %v87_v17 = vmul.f32 %v85_v16, %v85_v16 }
  0xd6   :  { %90 = vadd.xlane.f32.xlu1 %v87_v17 }
 0x15f   :  { %v89_v31 = vpop.xlane.xlu1 %88 }
 0x160   :  { %v92_v32 = vmul.f32 0.03125, %v89_v31 }
 0x162   :  { %v94_v33 = vadd.f32 1e-05, %v92_v32 }
 0x163   :  { %v91_v34 = vpop.xlane.xlu1 %90 }
 0x164   :  { %470 = vrsqrt.f32 %v94_v33  ;;  %v93_v35 = vmul.f32 0.03125, %v91_v34 }
 0x166   :  { %v95_v36 = vadd.f32 1e-05, %v93_v35 }
 0x168   :  { %472 = vrsqrt.f32 %v95_v36 }
 0x16e   :  { %v471_v37 = vpop.eup %470 }
 0x16f   :  { %v98_v38 = vmul.f32 %v471_v37, %v84_v13 }
 0x171   :  { %v107_v42 = vmul.f32 %v366_v39, %v98_v38 }
 0x172   :  { %v473_v40 = vpop.eup %472 }
 0x173   :  { %v99_v41 = vmul.f32 %v473_v40, %v85_v16  ;;  %v116_v45 = vadd.f32 %v367_v43, %v107_v42 }
 0x175   :  { %v108_v44 = vmul.f32 %v366_v39, %v99_v41 }
 0x177   :  { %v117_v46 = vadd.f32 %v367_v43, %v108_v44 }
 0x179   :  { %v118_v47 = vpack.c.bf16 %v117_v46, %v116_v45 }
 0x17b   :  { %421 = vmatmul.mubr.bf16.vlgmr.msra.gmra.mrb[0].mxu0 %v118_v47 }
 0x24e   :  { %v224_v51 = vpop.f32.mrb[0].mxu0 }
 0x24f   :  { %v225_v52 = vadd.f32 %v368_v50, %v224_v51  ;;  %v422_v53 = vpop.f32.mrb[1].mxu0 }
 0x250   :  { %v227_v54 = vpop.f32.mrb[2].mxu0 }
 0x251   :  { %v228_v55 = vadd.f32 %v368_v50, %v227_v54  ;;  %v423_v56 = vpop.f32.mrb[3].mxu0  ;;  %v231_v57 = vmax.f32 %v225_v52, 0.0 }
 0x253   :  { %v232_v58 = vmax.f32 %v228_v55, 0.0 }
 0x255   :  { %v233_v59 = vpack.c.bf16 %v232_v58, %v231_v57 }
 0x257   :  { %441 = vmatmul.mubr.bf16.vlgmr.msra.gmra.mrb[0].mxu1 %v233_v59 }
 0x32a   :  { %v339_v61 = vpop.f32.mrb[0].mxu1 }
 0x32b   :  { %v340_v62 = vadd.f32 %v377_v60, %v339_v61  ;;  %v442_v63 = vpop.f32.mrb[1].mxu1 }
 0x32c   :  { %v342_v0 = vpop.f32.mrb[2].mxu1 }
 0x32d   :  { %346 = vst [vmem:[#allocation8] sm:$0xff] %v340_v62  ;;  %v343_v1 = vadd.f32 %v377_v60, %v342_v0  ;;  %v443_v2 = vpop.f32.mrb[3].mxu1 }
 0x32f   :  { %347 = vst [vmem:[#allocation8 + $0x8] sm:$0xff] %v343_v1 }
 0x330   :  { %551 = shalt.err (!%p548_p0)
}
 0x331   :  { %s552_s24 = scalar_lea.hbm %s719_s7, 256 }
 0x332   :  { %p553_p1 = scmp.ne.s32.totalorder %s719_s7, %s552_s24  ;;  %p556_p2 = scmp.lt.u32.totalorder %s552_s24, %s719_s7 }
 0x334   :  { %p558_p3 = pnand %p556_p2, %p553_p1 }
 0x336   :  { %561 = shalt.err (!%p558_p3)
}
 0x337   :  { %359 = dma.vmem_to_hbm [thread:$0]  %s354_s22, 256, %s719_s7, [#allocation4], %s572_s3, %s572_s3, %s573_s25  }
 0x338   :  { %566 = dma.done.wait [#allocation4], 256  }
 0x339   :  { %567 = vsyncadd [#allocation4], 4294967040 }
 0x33a   :  { %363 = vsyncpa [#allocation3], 1 }
 0x33b   :  { %364 = vsyncpa [#allocation6], 1 }
 0x33c   :  { %365 = vsyncpa [#allocation4], 1 }

</bundles_post_ra>
